<compile_context>
chip_gen: v7x
topology: tpu7x:2x2x1
jax: 0.10.0
libtpu: 0.0.40
codegen_flags: <defaults>
</compile_context>

<pallas_src>
import functools
import math

import numpy as np

import jax
import jax.numpy as jnp
from jax.experimental import pallas as pl
from jax.experimental.pallas import tpu as pltpu


# ---------------------------------------------------------------------------
# device-aware tiling
# ---------------------------------------------------------------------------
@functools.lru_cache(maxsize=1)
def _tpu_info():
    """(tensorcores_per_chip, scoped_vmem_limit_bytes) with safe fallbacks."""
    vmem_capacity = 64 * 1024 * 1024          # conservative fallback (v7x/TC)
    try:
        info = pltpu.get_tpu_info()
        vmem_capacity = int(getattr(info, "vmem_capacity_bytes", vmem_capacity))
    except Exception:
        pass
    kind = ""
    try:
        kind = jax.devices()[0].device_kind.lower()
    except Exception:
        pass
    # v7x has 2 TensorCores/chip and only 64 MiB VMEM per TC; v5e/v6e: 1 TC,
    # 128 MiB VMEM.
    num_cores = 2 if "v7" in kind else 1
    if "v7" in kind:
        vmem_capacity = min(vmem_capacity, 64 * 1024 * 1024)
    # scoped limit: half of physical, capped at 64 MiB (=> 64 MiB on v5e/v6e,
    # 32 MiB on v7x / unknown devices).
    scoped_limit = max(16 * 1024 * 1024,
                       min(vmem_capacity // 2, 64 * 1024 * 1024))
    return num_cores, scoped_limit


def _choose_tile(seq_len: int, embedding_dim: int) -> int:
    """Sequence tile: big enough to amortize per-step overhead, small enough to
    (a) fit the VMEM budget and (b) give >=2 grid steps per TensorCore so the
    output writeback DMA of tile i-1 overlaps the compute of tile i."""
    num_cores, scoped_limit = _tpu_info()
    # footprint ~ 2x output tile (double buffer) + ~2x tile of temporaries.
    per_tile_budget = scoped_limit // 4
    row_bytes = embedding_dim * 4
    max_rows = max(8, min(16384, (per_tile_budget // row_bytes) // 8 * 8))
    if seq_len <= 8:
        return seq_len                       # sublane floor: one tiny tile
    min_steps = 2 * num_cores                # 2 steps/TC (4 on v7x)
    target = -(-seq_len // min_steps)        # ceil
    target = ((target + 7) // 8) * 8         # multiple of 8 sublanes
    return max(8, min(max_rows, target))


# ---------------------------------------------------------------------------
# kernels
# ---------------------------------------------------------------------------
def _zero_padding_row(out_ref, padding_idx, row_off, tile_s, embedding_dim):
    pad_local = padding_idx - row_off

    @pl.when(jnp.logical_and(pad_local >= 0, pad_local < tile_s))
    def _():
        out_ref[pl.ds(pad_local, 1), :] = jnp.zeros(
            (1, embedding_dim), out_ref.dtype)


def _make_aligned_kernel(embedding_dim: int, padding_idx: int):
    """Even dim, half_dim % 128 == 0: exact cos, two unmasked aligned stores."""
    half_dim = embedding_dim // 2

    def kernel(freq_ref, out_ref):
        tile_s = out_ref.shape[0]
        row_off = pl.program_id(0) * tile_s
        pos = (row_off + jax.lax.broadcasted_iota(jnp.int32, (tile_s, 1), 0)
               ).astype(jnp.float32)
        angle = pos * freq_ref[...]                       # (tile_s, half_dim)
        out_ref[:, :half_dim] = jnp.sin(angle).astype(out_ref.dtype)
        out_ref[:, half_dim:] = jnp.cos(angle).astype(out_ref.dtype)
        _zero_padding_row(out_ref, padding_idx, row_off, tile_s, embedding_dim)

    return kernel


def _make_fullwidth_kernel(embedding_dim: int, padding_idx: int):
    """Unaligned / odd dim: sin(pos*freq + phase) -> one lane-dense store.
    phase = pi/2 on the cos half; freq = phase = 0 on the odd trailing column
    (so it is zero for free).  No lane concat, no materialized VMEM temp."""

    def kernel(freq_ref, phase_ref, out_ref):
        tile_s = out_ref.shape[0]
        row_off = pl.program_id(0) * tile_s
        pos = (row_off + jax.lax.broadcasted_iota(jnp.int32, (tile_s, 1), 0)
               ).astype(jnp.float32)
        out_ref[...] = jnp.sin(pos * freq_ref[...] + phase_ref[...]
                               ).astype(out_ref.dtype)
        _zero_padding_row(out_ref, padding_idx, row_off, tile_s, embedding_dim)

    return kernel


# ---------------------------------------------------------------------------
# table builder (lru-cached: depends only on shapes, never on input values)
# ---------------------------------------------------------------------------
@functools.lru_cache(maxsize=64)
def _build_table(seq_len: int, embedding_dim: int, padding_idx: int,
                 tile_s=None, out_dtype=jnp.float32):
    num_cores, scoped_limit = _tpu_info()
    del num_cores
    if tile_s is None:
        tile_s = _choose_tile(seq_len, embedding_dim)
    grid = (pl.cdiv(seq_len, tile_s),)

    half_dim = embedding_dim // 2
    # guard half_dim == 1 (torch formula would divide by zero)
    denom = (half_dim - 1) if half_dim > 1 else 1
    log_scale = math.log(10000.0) / denom
    freq_half = np.exp(np.arange(half_dim, dtype=np.float32)
                       * np.float32(-log_scale)).astype(np.float32)

    aligned = (embedding_dim % 2 == 0) and (half_dim % 128 == 0)

    if aligned:
        kernel = _make_aligned_kernel(embedding_dim, padding_idx)
        inputs = (jnp.asarray(freq_half.reshape(1, half_dim)),)
        in_specs = [pl.BlockSpec((1, half_dim), lambda i: (0, 0))]
    else:
        kernel = _make_fullwidth_kernel(embedding_dim, padding_idx)
        freq_full = np.zeros((1, embedding_dim), np.float32)
        phase_full = np.zeros((1, embedding_dim), np.float32)
        freq_full[0, :half_dim] = freq_half
        freq_full[0, half_dim:2 * half_dim] = freq_half
        phase_full[0, half_dim:2 * half_dim] = np.float32(np.pi / 2.0)
        inputs = (jnp.asarray(freq_full), jnp.asarray(phase_full))
        in_specs = [pl.BlockSpec((1, embedding_dim), lambda i: (0, 0)),
                    pl.BlockSpec((1, embedding_dim), lambda i: (0, 0))]

    return pl.pallas_call(
        kernel,
        out_shape=jax.ShapeDtypeStruct((seq_len, embedding_dim), out_dtype),
        grid=grid,
        in_specs=in_specs,
        out_specs=pl.BlockSpec((tile_s, embedding_dim), lambda i: (i, 0)),
        compiler_params=pltpu.CompilerParams(
            # "parallel" shards the single grid axis across v7x's 2 TCs; on
            # single-TC parts it only enables the normal writeback pipeline.
            dimension_semantics=("parallel",),
            vmem_limit_bytes=scoped_limit,
        ),
    )(*inputs)


def sinusoidal_positional_embedding(x, embedding_dim: int, padding_idx: int):
    """Forward pass of SinusoidalPositionalEmbedding.

    x: (bsz, seq_len, _) -- only the shape is used (padding symbols ignored).
    returns: (1, seq_len, embedding_dim) float32, matching the torch module.
    """
    _, seq_len, _ = x.shape
    return _build_table(seq_len, embedding_dim, padding_idx)[None, :, :]


# ---------------------------------------------------------------------------
# pure-JAX reference (mirrors the torch get_embedding)
# ---------------------------------------------------------------------------
def _reference(seq_len, embedding_dim, padding_idx):
    half_dim = embedding_dim // 2
    emb = math.log(10000.0) / (half_dim - 1)
    emb = jnp.exp(jnp.arange(half_dim, dtype=jnp.float32) * -emb)
    emb = jnp.arange(seq_len, dtype=jnp.float32)[:, None] * emb[None, :]
    emb = jnp.concatenate([jnp.sin(emb), jnp.cos(emb)], axis=1)
    if embedding_dim % 2 == 1:
        emb = jnp.concatenate([emb, jnp.zeros((seq_len, 1), jnp.float32)],
                              axis=1)
    emb = emb.at[padding_idx, :].set(0.0)
    return emb


if __name__ == "__main__":
    key = jax.random.PRNGKey(0)
    bsz, seq_len, hidden = 2, 8, 32
    embedding_dim = 32
    padding_idx = 0

    x = jax.random.normal(key, (bsz, seq_len, hidden), dtype=jnp.float32)

    out = sinusoidal_positional_embedding(x, embedding_dim, padding_idx)
    out = jax.block_until_ready(out)

    ref = _reference(seq_len, embedding_dim, padding_idx)[None, :, :]
    assert out.shape == (1, seq_len, embedding_dim), out.shape
    assert jnp.allclose(out, ref, atol=1e-5), float(jnp.max(jnp.abs(out - ref)))

    # multi-tile grid (even division), padding row inside the first tile
    t = jax.block_until_ready(_build_table(48, 64, 3, tile_s=16))
    assert jnp.allclose(t, _reference(48, 64, 3), atol=1e-5)

    # pl.cdiv grid with a partial last block (seq_len not a multiple of tile)
    t = jax.block_until_ready(_build_table(40, 32, 5, tile_s=16))
    assert jnp.allclose(t, _reference(40, 32, 5), atol=1e-5)

    # odd embedding_dim (trailing zero column via freq=0 / phase=0)
    t = jax.block_until_ready(_build_table(8, 33, 2))
    assert jnp.allclose(t, _reference(8, 33, 2), atol=1e-5)

    # lane-aligned fast path (half_dim % 128 == 0) with the auto tile choice
    # (>= 2 grid steps per TensorCore)
    t = jax.block_until_ready(_build_table(96, 256, 1))
    assert jnp.allclose(t, _reference(96, 256, 1), atol=1e-5)

    print("KERNEL_OK")
</pallas_src>

<mosaic_0001>
module attributes {stable_mosaic.version = 11 : i64} {
  func.func @kernel(%arg0: i32, %arg1: memref<1x32xf32, #tpu.memory_space<vmem>>, %arg2: memref<1x32xf32, #tpu.memory_space<vmem>>, %arg3: memref<8x32xf32, #tpu.memory_space<vmem>>) attributes {dimension_semantics = [#tpu.dimension_semantics<parallel>], iteration_bounds = array<i64: 1>, scalar_prefetch = 0 : i64, scratch_operands = 0 : i64, tpu.core_type = #tpu.core_type<tc>, window_params = [{pipeline_mode = #tpu.pipeline_mode<synchronous>, transform_indices = @transform_0, window_bounds = array<i64: 1, 32>}, {pipeline_mode = #tpu.pipeline_mode<synchronous>, transform_indices = @transform_1, window_bounds = array<i64: 1, 32>}, {transform_indices = @transform_2, window_bounds = array<i64: 8, 32>}]} {
    %c8_i32 = arith.constant 8 : i32
    %0 = arith.muli %arg0, %c8_i32 : i32
    %1 = tpu.iota {dimensions = array<i32: 0>} : vector<8x1xi32>
    %2 = vector.broadcast %0 : i32 to vector<8x1xi32>
    %3 = arith.addi %2, %1 : vector<8x1xi32>
    %4 = arith.sitofp %3 : vector<8x1xi32> to vector<8x1xf32>
    %c0 = arith.constant 0 : index
    %c0_0 = arith.constant 0 : index
    %5 = vector.load %arg1[%c0, %c0_0] : memref<1x32xf32, #tpu.memory_space<vmem>>, vector<1x32xf32>
    %6 = vector.broadcast %4 : vector<8x1xf32> to vector<8x32xf32>
    %7 = vector.broadcast %5 : vector<1x32xf32> to vector<8x32xf32>
    %8 = arith.mulf %6, %7 : vector<8x32xf32>
    %c0_1 = arith.constant 0 : index
    %c0_2 = arith.constant 0 : index
    %9 = vector.load %arg2[%c0_1, %c0_2] : memref<1x32xf32, #tpu.memory_space<vmem>>, vector<1x32xf32>
    %10 = vector.broadcast %9 : vector<1x32xf32> to vector<8x32xf32>
    %11 = arith.addf %8, %10 : vector<8x32xf32>
    %12 = math.sin %11 : vector<8x32xf32>
    %c0_3 = arith.constant 0 : index
    %c0_4 = arith.constant 0 : index
    %13 = vector.load %arg3[%c0_3, %c0_4] : memref<8x32xf32, #tpu.memory_space<vmem>>, vector<8x32xf32>
    tpu.vector_store %arg3[%c0_3, %c0_4], %12 {strides = array<i32>} : memref<8x32xf32, #tpu.memory_space<vmem>>, vector<8x32xf32>,
    %c0_i32 = arith.constant 0 : i32
    %14 = arith.subi %c0_i32, %0 : i32
    %c0_i32_5 = arith.constant 0 : i32
    %15 = arith.cmpi sge, %14, %c0_i32_5 : i32
    %c8_i32_6 = arith.constant 8 : i32
    %16 = arith.cmpi slt, %14, %c8_i32_6 : i32
    %17 = arith.andi %15, %16 : i1
    %18 = arith.extui %17 : i1 to i32
    %c0_i32_7 = arith.constant 0 : i32
    %19 = arith.cmpi ne, %18, %c0_i32_7 : i32
    scf.if %19 {
      %cst = arith.constant 0.000000e+00 : f32
      %20 = vector.broadcast %cst : f32 to vector<1x32xf32>
      %21 = arith.index_cast %14 : i32 to index
      %c0_8 = arith.constant 0 : index
      %22 = vector.load %arg3[%21, %c0_8] : memref<8x32xf32, #tpu.memory_space<vmem>>, vector<1x32xf32>
      tpu.vector_store %arg3[%21, %c0_8], %20 {strides = array<i32>} : memref<8x32xf32, #tpu.memory_space<vmem>>, vector<1x32xf32>,
    } else {
    }
    return
  }
  func.func @transform_0(%arg0: i32) -> (i32, i32) {
    %c0_i32 = arith.constant 0 : i32
    %c0_i32_0 = arith.constant 0 : i32
    %c0_i32_1 = arith.constant 0 : i32
    return %c0_i32, %c0_i32_0 : i32, i32
  }
  func.func @transform_1(%arg0: i32) -> (i32, i32) {
    %c0_i32 = arith.constant 0 : i32
    %c0_i32_0 = arith.constant 0 : i32
    %c0_i32_1 = arith.constant 0 : i32
    return %c0_i32, %c0_i32_0 : i32, i32
  }
  func.func @transform_2(%arg0: i32) -> (i32, i32) {
    %c0_i32 = arith.constant 0 : i32
    %c0_i32_0 = arith.constant 0 : i32
    return %arg0, %c0_i32 : i32, i32
  }
}

</mosaic_0001>

<bundles_post_ra>
// kernel: tpu_custom_call.1
= control target key start
LH: loop header
LB: loop body
LE: loop exit
PB: predicated region body
PF: predicated region fallthrough
CT: control target
= control target key end

     0   :  { %7 = vsyncpa [#allocation3], 0  ;;  %s321_s0 = inlined_call_operand.hbm [shape: f32[1,32], index: 0, kind: input, shape index: {}]   ;;  %s322_s1 = inlined_call_operand.vmem [shape: f32[1,32], index: 1, kind: input, shape index: {}]   ;;  %s323_s2 = inlined_call_operand.hbm [shape: f32[8,32], index: 2, kind: output, shape index: {}]  }
   0x1   :  { %8 = vsyncpa [#allocation4], 0  ;;  %s249_s9 = smov [#allocation2]   ;;  %s201_s13 = scalar_lea.hbm %s321_s0, 16 }
   0x2   :  { %s15_s10 = sshll.u32 %s249_s9, 4  ;;  %p202_p0 = scmp.ne.s32.totalorder %s321_s0, %s201_s13  ;;  %s16_s10 = int_to_ptr.vmem [resolvable:$true] %s15_s10 }
   0x3   :  { %p205_p1 = scmp.lt.u32.totalorder %s201_s13, %s321_s0 }
   0x5   :  { %p207_p2 = pnand %p205_p1, %p202_p0 }
   0x7   :  { %210 = shalt.err (!%p207_p2)
}
   0x8   :  { %s211_s18 = scalar_lea.vmem %s16_s10, 16  ;;  %s215_s19 = scalar_lea.vmem %s16_s10, 32 }
   0x9   :  { %p212_p3 = scmp.ne.s32.totalorder %s16_s10, %s211_s18  ;;  %p216_p4 = scmp.lt.s32.totalorder %s16_s10, %s16_s10 }
   0xa   :  { %p217_p5 = scmp.lt.s32.totalorder %s215_s19, %s211_s18 }
   0xc   :  { %p218_p6 = por %p217_p5, %p216_p4 }
   0xe   :  { %p219_p7 = pnand %p218_p6, %p212_p3 }
  0x10   :  { %222 = shalt.err (!%p219_p7)
}
  0x11   :  { %18 = dma.hbm_to_vmem [thread:$0]  %s321_s0, 16, %s16_s10, [#allocation3]  }
  0x12   :  { %245 = dma.done.wait [#allocation3], 16  }
  0x13   :  { %246 = vsyncadd [#allocation3], 4294967280  ;;  %v25_v0 = vlaneseq  ;;  %v178_v3 = vld [vmem:[#allocation2] ss:$0 sm:$0xff]  ;;  %v250_v18 = vmov 683565275  }
  0x14   :  { %v179_v4 = vld [vmem:[%s322_s1] ss:$0 sm:$0xff]  ;;  %v251_v20 = vmov 2475754826   ;;  %v252_v22 = vmov 2131351028  }
  0x15   :  { %v26_v1 = vshrl.u32 %v25_v0, 7  ;;  %v253_v24 = vmov 2102212464   ;;  %v254_v26 = vmov 920167782   ;;  %s256_s0 = smov [#allocation5]  }
  0x16   :  { %v255_v33 = vmov 1326507024   ;;  %s168_s1 = sshll.u32 %s256_s0, 4  ;;  %vm150_vm13 = vcmask 261120   ;;  %vm160_vm14 = vcmask 253952   ;;  %s169_s1 = int_to_ptr.vmem [resolvable:$true] %s168_s1 }
  0x17   :  { %v29_v2 = vcvt.s32.f32 %v26_v1  ;;  %s223_s24 = scalar_lea.vmem %s169_s1, 128  ;;  %p228_p9 = scmp.lt.s32.totalorder %s169_s1, %s169_s1 }
  0x18   :  { %p224_p8 = scmp.ne.s32.totalorder %s169_s1, %s223_s24  ;;  %p229_p10 = scmp.lt.s32.totalorder %s223_s24, %s223_s24 }
  0x19   :  { %v37_v5 = vmul.f32 %v178_v3, %v29_v2 }
  0x1a   :  { %p230_p11 = por %p229_p10, %p228_p9 }
  0x1b   :  { %v288_v6 = vadd.f32 %v179_v4, %v37_v5 }
  0x1c   :  { %p231_p12 = pnand %p230_p11, %p224_p8 }
  0x1d   :  { %v49_v7 = vand.u32 2139095040, %v288_v6  ;;  %v46_v9 = vand.u32 2147483647, %v288_v6  ;;  %vm48_vm7 = vcmp.lt.s32.totalorder %v288_v6, 0  ;;  %vm138_vm12 = vweird.f32 %v288_v6 }
  0x1f   :  { %v50_v8 = vshrl.u32 %v49_v7, 23  ;;  %v53_v12 = vand.u32 8388607, %v46_v9  ;;  %vm47_vm8 = vcmp.le.f32.partialorder %v46_v9, 0.7853982 }
  0x21   :  { %v180_v10 = vadd.s32 4294967169, %v50_v8  ;;  %v54_v15 = vor.u32 8388608, %v53_v12 }
  0x23   :  { %v56_v11 = vadd.s32 1, %v180_v10  ;;  %v94_v35 = vshll.u32 %v54_v15, 8 }
  0x25   :  { %vm57_vm0 = vcmp.gt.s32.totalorder %v56_v11, 0 }
  0x26   :  { %v58_v13 = vsel %vm57_vm0, %v56_v11, 0 }
  0x27   :  { %v60_v14 = vand.u32 31, %v58_v13  ;;  %v59_v16 = vshrl.u32 %v58_v13, 5 }
  0x29   :  { %v61_v17 = vsub.s32 32, %v60_v14  ;;  %v63_v19 = vshll.u32 %v250_v18, %v60_v14  ;;  %v66_v21 = vshll.u32 %v251_v20, %v60_v14  ;;  %v69_v23 = vshll.u32 %v252_v22, %v60_v14 }
  0x2a   :  { %v72_v25 = vshll.u32 %v253_v24, %v60_v14  ;;  %v75_v27 = vshll.u32 %v254_v26, %v60_v14  ;;  %vm78_vm1 = vcmp.lt.s32.totalorder %v59_v16, 1  ;;  %vm81_vm2 = vcmp.lt.s32.totalorder %v59_v16, 4 }
  0x2b   :  { %v62_v28 = vshrl.u32 %v250_v18, %v61_v17  ;;  %v64_v29 = vshrl.u32 %v251_v20, %v61_v17  ;;  %v67_v30 = vshrl.u32 %v252_v22, %v61_v17  ;;  %v70_v31 = vshrl.u32 %v253_v24, %v61_v17 }
  0x2c   :  { %v73_v32 = vshrl.u32 %v254_v26, %v61_v17  ;;  %v76_v34 = vshrl.u32 %v255_v33, %v61_v17  ;;  %vm79_vm3 = vcmp.lt.s32.totalorder %v59_v16, 2  ;;  %vm80_vm4 = vcmp.lt.s32.totalorder %v59_v16, 3 }
  0x2d   :  { %v65_v36 = vor.u32 %v64_v29, %v63_v19  ;;  %v68_v37 = vor.u32 %v67_v30, %v66_v21  ;;  %v71_v38 = vor.u32 %v70_v31, %v69_v23 }
  0x2e   :  { %v74_v39 = vor.u32 %v73_v32, %v72_v25  ;;  %v77_v40 = vor.u32 %v76_v34, %v75_v27 }
  0x2f   :  { %v82_v41 = vsel %vm78_vm1, %v62_v28, %v65_v36  ;;  %v83_v42 = vsel %vm81_vm2, %v71_v38, 2102212464  ;;  %v86_v43 = vsel %vm78_vm1, %v65_v36, %v68_v37  ;;  %v90_v44 = vsel %vm78_vm1, %v68_v37, %v71_v38 }
  0x30   :  { %v84_v45 = vsel %vm80_vm4, %v68_v37, %v83_v42  ;;  %v87_v46 = vsel %vm81_vm2, %v74_v39, 920167782  ;;  %v91_v47 = vsel %vm81_vm2, %v77_v40, 1326507024 }
  0x31   :  { %v88_v48 = vsel %vm80_vm4, %v71_v38, %v87_v46  ;;  %v92_v49 = vsel %vm80_vm4, %v74_v39, %v91_v47  ;;  %v85_v50 = vsel %vm79_vm3, %v82_v41, %v84_v45 }
  0x32   :  { %v89_v51 = vsel %vm79_vm3, %v86_v43, %v88_v48  ;;  %v93_v52 = vsel %vm79_vm3, %v90_v44, %v92_v49  ;;  %v101_v57 = vmul.u32 %v94_v35, %v85_v50 }
  0x33   :  { %v294_v53 = vmul.u32.u64.low %v94_v35, %v93_v52  ;;  %v295_v54 = vmul.u32.u64.high %v94_v35, %v93_v52, %v294_v53  ;;  %v297_v55 = vmul.u32.u64.low %v94_v35, %v89_v51  ;;  %v298_v56 = vmul.u32.u64.high %v94_v35, %v89_v51, %v297_v55 }
  0x34   :  { %v257_v35 = vmov 0.0  }
  0x35   :  { %vm103_vm5 = vc.u32 %v295_v54, %v297_v55  ;;  %v104_v58 = vadd.s32 1, %v298_v56  ;;  %v102_v5 = vadd.s32 %v297_v55, %v295_v54 }
  0x37   :  { %v105_v59 = vsel %vm103_vm5, %v104_v58, %v298_v56 }
  0x38   :  { %v106_v60 = vadd.s32 %v105_v59, %v101_v57 }
  0x3a   :  { %v107_v61 = vadd.s32 536870912, %v106_v60 }
  0x3c   :  { %v108_v62 = vshrl.u32 %v107_v61, 30 }
  0x3e   :  { %v109_v63 = vshll.u32 %v108_v62, 30  ;;  %v132_v19 = vsub.s32 4, %v108_v62 }
  0x40   :  { %v110_v0 = vsub.s32 %v106_v60, %v109_v63  ;;  %v133_v22 = vsel %vm48_vm7, %v132_v19, %v108_v62 }
  0x41   :  { %v135_v25 = vsel %vm47_vm8, 0, %v133_v22 }
  0x42   :  { %v112_v1 = vsub.s32 0, %v110_v0  ;;  %v139_v26 = vadd.s32 3, %v135_v25 }
  0x44   :  { %v181_v2 = vmin.u32 %v112_v1, %v110_v0  ;;  %v140_v27 = vand.u32 3, %v139_v26 }
  0x46   :  { %v114_v3 = vclz %v181_v2  ;;  %vm145_vm9 = vcmp.eq.s32.totalorder %v140_v27, 2  ;;  %vm142_vm10 = vcmp.eq.s32.totalorder %v140_v27, 0  ;;  %vm141_vm11 = vcmp.lt.s32.totalorder %v140_v27, 2 }
  0x48   :  { %v182_v4 = vadd.s32 4294967294, %v114_v3 }
  0x4a   :  { %vm183_vm6 = vcmp.lt.s32.totalorder %v182_v4, 0 }
  0x4b   :  { %v117_v7 = vsel %vm183_vm6, 0, %v182_v4 }
  0x4c   :  { %v118_v8 = vsub.s32 32, %v117_v7  ;;  %v119_v10 = vshll.u32 %v110_v0, %v117_v7  ;;  %v122_v11 = vsub.s32 4294967266, %v117_v7 }
  0x4e   :  { %v120_v12 = vshrl.u32 %v102_v5, %v118_v8  ;;  %v123_v13 = vadd.s32 127, %v122_v11 }
  0x50   :  { %v121_v14 = vor.u32 %v120_v12, %v119_v10  ;;  %v124_v15 = vshll.u32 %v123_v13, 23 }
  0x52   :  { %v125_v16 = vor.u32 4788187, %v124_v15  ;;  %v128_v17 = vcvt.s32.f32 %v121_v14 }
  0x54   :  { %v126_v18 = vand.u32 2147483647, %v125_v16 }
  0x56   :  { %v129_v20 = vmul.f32 %v128_v17, %v126_v18 }
  0x58   :  { %v130_v21 = vxor.u32 2147483648, %v129_v20 }
  0x5a   :  { %v131_v23 = vsel %vm48_vm7, %v130_v21, %v129_v20 }
  0x5b   :  { %v134_v24 = vsel %vm47_vm8, %v288_v6, %v131_v23 }
  0x5c   :  { %197 = vcosq.f32 %v134_v24 }
  0x5d   :  { %199 = vsinq.f32 %v134_v24 }
  0x66   :  { %v198_v28 = vpop.eup %197 }
  0x67   :  { %v200_v29 = vpop.eup %199  ;;  %v146_v30 = vxor.u32 2147483648, %v198_v28 }
  0x68   :  { %v143_v31 = vxor.u32 2147483648, %v200_v29 }
  0x69   :  { %v147_v9 = vsel %vm145_vm9, %v146_v30, %v200_v29 }
  0x6a   :  { %v144_v32 = vsel %vm142_vm10, %v198_v28, %v143_v31 }
  0x6b   :  { %v148_v33 = vsel %vm141_vm11, %v144_v32, %v147_v9 }
  0x6c   :  { %v149_v34 = vsel %vm138_vm12, nan, %v148_v33 }
  0x6d   :  { %151 = vst.msk [vmem:[#allocation5] sm:$0xff] %vm150_vm13, %v149_v34 }
  0x6e   :  { %161 = vst.msk [vmem:[#allocation5] sm:$0x1] %vm160_vm14, %v257_v35 }
  0x6f   :  { %234 = shalt.err (!%p231_p12)
}
  0x70   :  { %s235_s27 = scalar_lea.hbm %s323_s2, 128 }
  0x71   :  { %p236_p13 = scmp.ne.s32.totalorder %s323_s2, %s235_s27  ;;  %p239_p0 = scmp.lt.u32.totalorder %s235_s27, %s323_s2 }
  0x73   :  { %p241_p1 = pnand %p239_p0, %p236_p13 }
  0x75   :  { %244 = shalt.err (!%p241_p1)
}
  0x76   :  { %171 = dma.vmem_to_hbm [thread:$0]  %s169_s1, 128, %s323_s2, [#allocation4]  }
  0x77   :  { %247 = dma.done.wait [#allocation4], 128  }
  0x78   :  { %248 = vsyncadd [#allocation4], 4294967168 }
  0x79   :  { %175 = vsyncpa [#allocation3], 1 }
  0x7a   :  { %176 = vsyncpa [#allocation4], 1 }

</bundles_post_ra>
